<compile_context>
chip_gen: v6e
topology: v6e:2x2x1
jax: 0.10.0
libtpu: 0.0.40
codegen_flags: <defaults>
</compile_context>

<pallas_src>
import jax
import jax.numpy as jnp
from jax.experimental import pallas as pl
from jax.experimental.pallas import tpu as pltpu

PERCENTILE = 0.1
LANES = 128


def _chip_config():
    """(max_tile_m, n_split) tuned per TPU generation."""
    try:
        kind = jax.devices()[0].device_kind.lower()
    except Exception:
        kind = ""
    if "v7" in kind or "7x" in kind:
        # 2 TensorCores @ ~3.2 TB/s each: larger blocks + 2-way core split.
        return 8192, 2
    # v5e / v6e: single TensorCore; 4096 rows = 2 MiB f32 per input block.
    return 4096, 1


def _make_kernel(tile_m, valid_rows, acc_rows):
    """Streaming partial-sum kernel.

    yp_ref, yt_ref : (tile_m, 128) VMEM tiles in the caller's native dtype.
    out_ref        : (1, acc_rows, 128) f32 block, resident across the inner
                     (reduction) grid axis.
    """
    fold = (tile_m % 8 == 0)  # acc_rows == 8 in this case

    def kernel(yp_ref, yt_ref, out_ref):
        i = pl.program_id(1)

        @pl.when(i == 0)
        def _init():
            out_ref[...] = jnp.zeros_like(out_ref)

        # Logical (unclamped) row-block index; redundant clamped steps fall into
        # the fully-masked edge path below.
        blk = pl.program_id(0) * pl.num_programs(1) + i
        row0 = blk * tile_m

        def accumulate(diff):
            loss = jnp.maximum(diff * PERCENTILE, diff * (PERCENTILE - 1.0))
            if fold:
                # Sublane-aligned fold: (tile_m,128)->(tile_m//8,8,128), sum over
                # the leading axis (pure VPU adds, exactly one per loaded vreg).
                out_ref[0] += jnp.sum(loss.reshape(tile_m // 8, 8, LANES), axis=0)
            else:
                out_ref[0] += loss

        # Fast path: fully interior block -> no per-element mask math.
        @pl.when(row0 + tile_m <= valid_rows)
        def _interior():
            diff = yt_ref[...].astype(jnp.float32) - yp_ref[...].astype(jnp.float32)
            accumulate(diff)

        # Edge / redundant block: mask rows past the valid range.  The mask is
        # applied to `diff` BEFORE the multiplies so stale-VMEM NaN/Inf in the
        # out-of-range rows cannot poison the sum.
        @pl.when(row0 + tile_m > valid_rows)
        def _edge():
            rows = jax.lax.broadcasted_iota(jnp.int32, (tile_m, LANES), 0)
            valid = (row0 + rows) < valid_rows
            diff = yt_ref[...].astype(jnp.float32) - yp_ref[...].astype(jnp.float32)
            diff = jnp.where(valid, diff, 0.0)
            accumulate(diff)

    return kernel


@jax.jit
def quantile_loss(y_pred, y_true):
    """JAX/Pallas equivalent of quantile_loss.forward(y_pred, y_true)."""
    assert y_pred.shape == y_true.shape
    n = y_pred.size  # static python int

    yp = y_pred.reshape(-1)
    yt = y_true.reshape(-1)

    rem = n % LANES
    n_aligned = n - rem

    # Ragged (<=127 element) lane tail: tiny jnp expression in the wrapper, so
    # the kernel only ever sees the lane-aligned region (no full-array pad).
    if rem:
        td = yt[n_aligned:].astype(jnp.float32) - yp[n_aligned:].astype(jnp.float32)
        tail_sum = jnp.sum(jnp.maximum(td * PERCENTILE, td * (PERCENTILE - 1.0)))
        yp = yp[:n_aligned]
        yt = yt[:n_aligned]
    else:
        tail_sum = jnp.float32(0.0)

    if n_aligned == 0:
        return tail_sum / jnp.float32(n)

    m = n_aligned // LANES
    yp2d = yp.reshape(m, LANES)
    yt2d = yt.reshape(m, LANES)

    max_tile_m, chip_split = _chip_config()

    # Row-tile: as large as possible, multiple of 8 (or the full row extent).
    if m <= max_tile_m and (m % 8 == 0 or m < 8):
        tile_m = m
    else:
        tile_m = min(max_tile_m, (m // 8) * 8)
    acc_rows = 8 if tile_m % 8 == 0 else tile_m

    blocks_total = -(-m // tile_m)            # ceil
    n_split = min(chip_split, blocks_total)   # leading "parallel" axis (v7x: 2 TCs)
    bps = -(-blocks_total // n_split)         # blocks per split

    def in_map(c, i):
        # Clamp so every DMA stays in-bounds; redundant steps are neutralized
        # in-kernel via the (unclamped) row-range mask.
        blk = jnp.minimum(c * bps + i, blocks_total - 1)
        return (blk, 0)

    itemsize = jnp.dtype(y_pred.dtype).itemsize
    in_block_bytes = tile_m * LANES * itemsize
    vmem_needed = 2 * 2 * in_block_bytes + 4 * acc_rows * LANES * 4
    vmem_limit = int(min(max(2 * vmem_needed, 16 << 20), 40 << 20))

    partials = pl.pallas_call(
        _make_kernel(tile_m, m, acc_rows),
        out_shape=jax.ShapeDtypeStruct((n_split, acc_rows, LANES), jnp.float32),
        grid_spec=pltpu.PrefetchScalarGridSpec(
            num_scalar_prefetch=0,
            grid=(n_split, bps),
            in_specs=[
                pl.BlockSpec((tile_m, LANES), in_map),
                pl.BlockSpec((tile_m, LANES), in_map),
            ],
            out_specs=pl.BlockSpec((1, acc_rows, LANES), lambda c, i: (c, 0, 0)),
        ),
        compiler_params=pltpu.CompilerParams(
            dimension_semantics=("parallel", "arbitrary"),
            vmem_limit_bytes=vmem_limit,
        ),
        cost_estimate=pl.CostEstimate(
            flops=5 * n_aligned,
            transcendentals=0,
            bytes_accessed=2 * n_aligned * itemsize + n_split * acc_rows * LANES * 4,
        ),
    )(yp2d, yt2d)

    # Tiny final reduction over the (n_split, 8, 128) partial slab, then mean.
    return (jnp.sum(partials) + tail_sum) / jnp.float32(n)


def _reference(y_pred, y_true):
    diff = y_true.astype(jnp.float32) - y_pred.astype(jnp.float32)
    return jnp.mean(jnp.maximum(diff * PERCENTILE, diff * (PERCENTILE - 1.0)))


if __name__ == "__main__":
    key = jax.random.PRNGKey(0)
    k1, k2 = jax.random.split(key)

    # Small shapes consistent with a typical regression output: (N, C, H, W)
    shape = (2, 4, 16, 16)
    y_pred = jax.random.normal(k1, shape, dtype=jnp.float32)
    y_true = jax.random.normal(k2, shape, dtype=jnp.float32)

    out = quantile_loss(y_pred, y_true)
    out = jax.block_until_ready(out)

    ref = _reference(y_pred, y_true)
    assert jnp.allclose(out, ref, rtol=1e-5, atol=1e-6), (out, ref)

    print("KERNEL_OK")
</pallas_src>

<mosaic_0001>
module attributes {stable_mosaic.version = 11 : i64} {
  func.func @kernel(%arg0: i32, %arg1: i32, %arg2: memref<16x128xf32, #tpu.memory_space<vmem>>, %arg3: memref<16x128xf32, #tpu.memory_space<vmem>>, %arg4: memref<1x8x128xf32, #tpu.memory_space<vmem>>) attributes {dimension_semantics = [#tpu.dimension_semantics<parallel>, #tpu.dimension_semantics<arbitrary>], iteration_bounds = array<i64: 1, 1>, scalar_prefetch = 0 : i64, scratch_operands = 0 : i64, tpu.core_type = #tpu.core_type<tc>, window_params = [{transform_indices = @transform_0, window_bounds = array<i64: 16, 128>}, {transform_indices = @transform_1, window_bounds = array<i64: 16, 128>}, {transform_indices = @transform_2, window_bounds = array<i64: 1, 8, 128>}]} {
    %c0_i32 = arith.constant 0 : i32
    %0 = arith.cmpi eq, %arg1, %c0_i32 : i32
    %1 = arith.extui %0 : i1 to i32
    %c0_i32_0 = arith.constant 0 : i32
    %2 = arith.cmpi ne, %1, %c0_i32_0 : i32
    scf.if %2 {
      %cst = arith.constant 0.000000e+00 : f32
      %14 = vector.broadcast %cst : f32 to vector<1x8x128xf32>
      %c0 = arith.constant 0 : index
      %c0_7 = arith.constant 0 : index
      %c0_8 = arith.constant 0 : index
      %15 = vector.load %arg4[%c0, %c0_7, %c0_8] : memref<1x8x128xf32, #tpu.memory_space<vmem>>, vector<1x8x128xf32>
      tpu.vector_store %arg4[%c0, %c0_7, %c0_8], %14 {strides = array<i32>} : memref<1x8x128xf32, #tpu.memory_space<vmem>>, vector<1x8x128xf32>,
    } else {
    }
    %c1_i32 = arith.constant 1 : i32
    %3 = arith.muli %arg0, %c1_i32 : i32
    %4 = arith.addi %3, %arg1 : i32
    %c16_i32 = arith.constant 16 : i32
    %5 = arith.muli %4, %c16_i32 : i32
    %c16_i32_1 = arith.constant 16 : i32
    %6 = arith.addi %5, %c16_i32_1 : i32
    %c16_i32_2 = arith.constant 16 : i32
    %7 = arith.cmpi sle, %6, %c16_i32_2 : i32
    %8 = arith.extui %7 : i1 to i32
    %c0_i32_3 = arith.constant 0 : i32
    %9 = arith.cmpi ne, %8, %c0_i32_3 : i32
    scf.if %9 {
      %c0 = arith.constant 0 : index
      %c0_7 = arith.constant 0 : index
      %14 = vector.load %arg3[%c0, %c0_7] : memref<16x128xf32, #tpu.memory_space<vmem>>, vector<16x128xf32>
      %c0_8 = arith.constant 0 : index
      %c0_9 = arith.constant 0 : index
      %15 = vector.load %arg2[%c0_8, %c0_9] : memref<16x128xf32, #tpu.memory_space<vmem>>, vector<16x128xf32>
      %16 = arith.subf %14, %15 : vector<16x128xf32>
      %cst = arith.constant 1.000000e-01 : f32
      %17 = vector.broadcast %cst : f32 to vector<16x128xf32>
      %18 = arith.mulf %16, %17 : vector<16x128xf32>
      %cst_10 = arith.constant -0.899999976 : f32
      %19 = vector.broadcast %cst_10 : f32 to vector<16x128xf32>
      %20 = arith.mulf %16, %19 : vector<16x128xf32>
      %21 = arith.maximumf %18, %20 : vector<16x128xf32>
      %c0_11 = arith.constant 0 : index
      %c0_12 = arith.constant 0 : index
      %c0_13 = arith.constant 0 : index
      %22 = vector.load %arg4[%c0_11, %c0_12, %c0_13] : memref<1x8x128xf32, #tpu.memory_space<vmem>>, vector<1x8x128xf32>
      %23 = vector.shape_cast %22 : vector<1x8x128xf32> to vector<8x128xf32>
      %24 = vector.shape_cast %21 : vector<16x128xf32> to vector<2x8x128xf32>
      %cst_14 = arith.constant dense<0.000000e+00> : vector<8x128xf32>
      %25 = vector.multi_reduction <add>, %24, %cst_14 [0] : vector<2x8x128xf32> to vector<8x128xf32>
      %26 = arith.addf %23, %25 : vector<8x128xf32>
      %c0_15 = arith.constant 0 : index
      %c0_16 = arith.constant 0 : index
      %c0_17 = arith.constant 0 : index
      %27 = vector.load %arg4[%c0_15, %c0_16, %c0_17] : memref<1x8x128xf32, #tpu.memory_space<vmem>>, vector<1x8x128xf32>
      %28 = vector.shape_cast %27 : vector<1x8x128xf32> to vector<8x128xf32>
      %29 = vector.shape_cast %26 : vector<8x128xf32> to vector<1x8x128xf32>
      tpu.vector_store %arg4[%c0_15, %c0_16, %c0_17], %29 {strides = array<i32>} : memref<1x8x128xf32, #tpu.memory_space<vmem>>, vector<1x8x128xf32>,
    } else {
    }
    %c16_i32_4 = arith.constant 16 : i32
    %10 = arith.addi %5, %c16_i32_4 : i32
    %c16_i32_5 = arith.constant 16 : i32
    %11 = arith.cmpi sgt, %10, %c16_i32_5 : i32
    %12 = arith.extui %11 : i1 to i32
    %c0_i32_6 = arith.constant 0 : i32
    %13 = arith.cmpi ne, %12, %c0_i32_6 : i32
    scf.if %13 {
      %14 = tpu.iota {dimensions = array<i32: 0>} : vector<16x128xi32>
      %15 = vector.broadcast %5 : i32 to vector<16x128xi32>
      %16 = arith.addi %15, %14 : vector<16x128xi32>
      %c16_i32_7 = arith.constant 16 : i32
      %17 = vector.broadcast %c16_i32_7 : i32 to vector<16x128xi32>
      %18 = arith.cmpi slt, %16, %17 : vector<16x128xi32>
      %c0 = arith.constant 0 : index
      %c0_8 = arith.constant 0 : index
      %19 = vector.load %arg3[%c0, %c0_8] : memref<16x128xf32, #tpu.memory_space<vmem>>, vector<16x128xf32>
      %c0_9 = arith.constant 0 : index
      %c0_10 = arith.constant 0 : index
      %20 = vector.load %arg2[%c0_9, %c0_10] : memref<16x128xf32, #tpu.memory_space<vmem>>, vector<16x128xf32>
      %21 = arith.subf %19, %20 : vector<16x128xf32>
      %cst = arith.constant 0.000000e+00 : f32
      %22 = vector.broadcast %cst : f32 to vector<16x128xf32>
      %23 = arith.select %18, %21, %22 : vector<16x128xi1>, vector<16x128xf32>
      %cst_11 = arith.constant 1.000000e-01 : f32
      %24 = vector.broadcast %cst_11 : f32 to vector<16x128xf32>
      %25 = arith.mulf %23, %24 : vector<16x128xf32>
      %cst_12 = arith.constant -0.899999976 : f32
      %26 = vector.broadcast %cst_12 : f32 to vector<16x128xf32>
      %27 = arith.mulf %23, %26 : vector<16x128xf32>
      %28 = arith.maximumf %25, %27 : vector<16x128xf32>
      %c0_13 = arith.constant 0 : index
      %c0_14 = arith.constant 0 : index
      %c0_15 = arith.constant 0 : index
      %29 = vector.load %arg4[%c0_13, %c0_14, %c0_15] : memref<1x8x128xf32, #tpu.memory_space<vmem>>, vector<1x8x128xf32>
      %30 = vector.shape_cast %29 : vector<1x8x128xf32> to vector<8x128xf32>
      %31 = vector.shape_cast %28 : vector<16x128xf32> to vector<2x8x128xf32>
      %cst_16 = arith.constant dense<0.000000e+00> : vector<8x128xf32>
      %32 = vector.multi_reduction <add>, %31, %cst_16 [0] : vector<2x8x128xf32> to vector<8x128xf32>
      %33 = arith.addf %30, %32 : vector<8x128xf32>
      %c0_17 = arith.constant 0 : index
      %c0_18 = arith.constant 0 : index
      %c0_19 = arith.constant 0 : index
      %34 = vector.load %arg4[%c0_17, %c0_18, %c0_19] : memref<1x8x128xf32, #tpu.memory_space<vmem>>, vector<1x8x128xf32>
      %35 = vector.shape_cast %34 : vector<1x8x128xf32> to vector<8x128xf32>
      %36 = vector.shape_cast %33 : vector<8x128xf32> to vector<1x8x128xf32>
      tpu.vector_store %arg4[%c0_17, %c0_18, %c0_19], %36 {strides = array<i32>} : memref<1x8x128xf32, #tpu.memory_space<vmem>>, vector<1x8x128xf32>,
    } else {
    }
    return
  }
  func.func @transform_0(%arg0: i32, %arg1: i32) -> (i32, i32) {
    %c1_i32 = arith.constant 1 : i32
    %0 = arith.muli %arg0, %c1_i32 : i32
    %1 = arith.addi %0, %arg1 : i32
    %c0_i32 = arith.constant 0 : i32
    %2 = arith.minsi %1, %c0_i32 : i32
    %c0_i32_0 = arith.constant 0 : i32
    %c0_i32_1 = arith.constant 0 : i32
    return %2, %c0_i32_0 : i32, i32
  }
  func.func @transform_1(%arg0: i32, %arg1: i32) -> (i32, i32) {
    %c1_i32 = arith.constant 1 : i32
    %0 = arith.muli %arg0, %c1_i32 : i32
    %1 = arith.addi %0, %arg1 : i32
    %c0_i32 = arith.constant 0 : i32
    %2 = arith.minsi %1, %c0_i32 : i32
    %c0_i32_0 = arith.constant 0 : i32
    %c0_i32_1 = arith.constant 0 : i32
    return %2, %c0_i32_0 : i32, i32
  }
  func.func @transform_2(%arg0: i32, %arg1: i32) -> (i32, i32, i32) {
    %c0_i32 = arith.constant 0 : i32
    %c0_i32_0 = arith.constant 0 : i32
    %c0_i32_1 = arith.constant 0 : i32
    return %arg0, %c0_i32, %c0_i32_0 : i32, i32, i32
  }
}

</mosaic_0001>

<bundles_post_ra>
// kernel: quantile_loss.1
= control target key start
LH: loop header
LB: loop body
LE: loop exit
PB: predicated region body
PF: predicated region fallthrough
CT: control target
= control target key end

     0   :  { %s180_s0 = inlined_call_operand.vmem [shape: f32[16,128], index: 0, kind: input, shape index: {}]   ;;  %s181_s1 = inlined_call_operand.vmem [shape: f32[16,128], index: 1, kind: input, shape index: {}]   ;;  %s182_s2 = inlined_call_operand.vmem [shape: f32[1,8,128], index: 2, kind: output, shape index: {}]  }
   0x1   :  { %v87_v0 = vld [vmem:[%s181_s1] sm:$0xff]  ;;  %v88_v1 = vld [vmem:[%s181_s1 + $0x8] sm:$0xff] }
   0x2   :  { %v89_v2 = vld [vmem:[%s180_s0] sm:$0xff]  ;;  %v90_v3 = vld [vmem:[%s180_s0 + $0x8] sm:$0xff] }
   0x3   :  { %v91_v4 = vsub.f32 %v87_v0, %v89_v2  ;;  %v92_v5 = vsub.f32 %v88_v1, %v90_v3 }
   0x5   :  { %v93_v6 = vmul.f32 0.1, %v91_v4  ;;  %v95_v7 = vmul.f32 -0.9, %v91_v4  ;;  %v94_v8 = vmul.f32 0.1, %v92_v5 }
   0x6   :  { %v96_v9 = vmul.f32 -0.9, %v92_v5 }
   0x7   :  { %v97_v10 = vmax.f32 %v93_v6, %v95_v7 }
   0x8   :  { %v98_v11 = vmax.f32 %v94_v8, %v96_v9 }
   0xa   :  { %v100_v12 = vadd.f32 %v98_v11, %v97_v10 }
   0xc   :  { %102 = vst [vmem:[%s182_s2] sm:$0xff] %v100_v12 }

</bundles_post_ra>
